<compile_context>
chip_gen: v6e
topology: v6e:2x2x1
jax: 0.10.0
libtpu: 0.0.40
codegen_flags: <defaults>
</compile_context>

<pallas_src>
import math

import jax
import jax.numpy as jnp
from jax.experimental import pallas as pl
from jax.experimental.pallas import tpu as pltpu


# ---------------------------------------------------------------------------
# Sinusoidal table (identical to PyTorch RelPositionEmbedding.get_pos_emb()).
# ---------------------------------------------------------------------------
def make_pos_emb_table(max_len: int, d_model: int) -> jnp.ndarray:
    pos = jnp.arange(max_len, dtype=jnp.float32)[:, None]                  # (L, 1)
    div_term = jnp.exp(
        jnp.arange(0, d_model, 2, dtype=jnp.float32) * (-math.log(10000.0) / d_model)
    )                                                                      # (d_model//2,)
    ang = pos * div_term                                                   # (L, d_model//2)
    emb = jnp.zeros((max_len, d_model), dtype=jnp.float32)
    emb = emb.at[:, 0::2].set(jnp.sin(ang))
    emb = emb.at[:, 1::2].set(jnp.cos(ang))
    return emb


# ---------------------------------------------------------------------------
# Kernels
# ---------------------------------------------------------------------------
def _copy_kernel(emb_ref, out_ref):
    # Dense, fully (8,128)-aligned copy: emb_ref and out_ref are (BR, W).
    out_ref[...] = emb_ref[...]


def _bcast_kernel(emb_ref, out_ref):
    # Fallback: emb_ref is (t, d_model), out_ref is (B, t, d_model).
    out_ref[...] = jnp.broadcast_to(emb_ref[...][None, :, :], out_ref.shape)


# ---------------------------------------------------------------------------
# Tiling heuristics
# ---------------------------------------------------------------------------
def _vmem_limits():
    """(vmem_limit_bytes for CompilerParams, budget for our block buffers)."""
    cap = None
    try:
        cap = getattr(pltpu.get_tpu_info(), "vmem_capacity_bytes", None)
    except Exception:
        cap = None
    if cap is None:
        cap = 64 * 1024 * 1024          # conservative default (v7x per-core VMEM)
    # Scoped limit we request: half of physical, capped at 28 MiB (leaves
    # headroom on v7x's 64 MiB physical VMEM; raises the old 8 MiB v5e/v6e cap).
    limit = min(cap // 2, 28 * 1024 * 1024)
    budget = (limit * 3) // 4           # headroom for Mosaic internals
    return limit, budget


def _choose_lane_width(E: int, cap: int = 2048):
    """Largest W (multiple of 128, <= cap) with W | E and (E // W) % 8 == 0."""
    w = min(cap, E)
    w -= w % 128
    while w >= 128:
        if E % w == 0 and (E // w) % 8 == 0:
            return w
        w -= 128
    return None


def _choose_block_rows(rows_per_copy: int, rows_total: int, W: int,
                       budget_bytes: int) -> int:
    """Largest BR (multiple of 8, BR | rows_per_copy) fitting the VMEM budget
    and leaving >= 2 grid steps when possible (v7x megacore sharding)."""
    # input block + output block, each double-buffered, f32.
    br_budget = (budget_bytes // (16 * W)) // 8 * 8
    cap = max(8, br_budget)
    if rows_total >= 16:
        cap = min(cap, (rows_total // 2) // 8 * 8)
    cap = min(cap, rows_per_copy)
    for cand in range(cap, 7, -8):
        if rows_per_copy % cand == 0:
            return cand
    return 8


def _choose_seq_tile_bcast(B: int, S: int, d_model: int, budget_bytes: int) -> int:
    def fits(t):
        # (1, t, d) input pads to >=8 sublanes; output block is B-way; both 2x buffered.
        return 2 * (max(t, 8) + B * t) * d_model * 4 <= budget_bytes

    cands = [t for t in range(8, S + 1, 8) if S % t == 0 and fits(t)]
    if cands:
        multi = [t for t in cands if S // t >= 2]
        return max(multi) if multi else max(cands)
    if S % 8 == 0:
        return 8            # smallest aligned tile; only hit for extreme B*d_model
    return S                # odd S: single full-extent tile (full-dim blocks are legal)


# ---------------------------------------------------------------------------
# Forward
# ---------------------------------------------------------------------------
def rel_position_embedding(x: jnp.ndarray, pos_emb_table: jnp.ndarray) -> jnp.ndarray:
    """Pallas equivalent of RelPositionEmbedding.forward(x) -> (B, S, d_model) f32."""
    B, S = x.shape[0], x.shape[1]
    max_len, d_model = pos_emb_table.shape
    assert S <= max_len, "sequence length exceeds max_len"

    table = pos_emb_table[:S, :].astype(jnp.float32)          # (S, d_model)
    E = S * d_model

    vmem_limit, budget = _vmem_limits()
    cparams = pltpu.CompilerParams(
        dimension_semantics=("parallel",),
        vmem_limit_bytes=vmem_limit,
    )
    cost = pl.CostEstimate(flops=0, transcendentals=0,
                           bytes_accessed=(B + 1) * E * 4)

    W = _choose_lane_width(E)
    if W is not None:
        # ---- Preferred dense-copy path: full (8,128) tile density ----
        rows_per_copy = E // W                                  # multiple of 8
        rows_total = B * rows_per_copy
        BR = _choose_block_rows(rows_per_copy, rows_total, W, budget)
        n_blocks_per_copy = rows_per_copy // BR
        grid = (rows_total // BR,)

        if n_blocks_per_copy == 1:
            in_map = lambda i: (0, 0)
        else:
            in_map = lambda i: (i % n_blocks_per_copy, 0)

        table_flat = table.reshape(rows_per_copy, W)            # contiguous reshape

        out_flat = pl.pallas_call(
            _copy_kernel,
            out_shape=jax.ShapeDtypeStruct((rows_total, W), jnp.float32),
            grid=grid,
            in_specs=[pl.BlockSpec((BR, W), in_map)],
            out_specs=pl.BlockSpec((BR, W), lambda i: (i, 0)),
            compiler_params=cparams,
            cost_estimate=cost,
        )(table_flat)
        return out_flat.reshape(B, S, d_model)

    # ---- Fallback path: 3-D broadcast blocks (odd S * d_model) ----
    t = _choose_seq_tile_bcast(B, S, d_model, budget)
    assert S % t == 0
    out = pl.pallas_call(
        _bcast_kernel,
        out_shape=jax.ShapeDtypeStruct((B, S, d_model), jnp.float32),
        grid=(S // t,),
        in_specs=[pl.BlockSpec((t, d_model), lambda s: (s, 0))],
        out_specs=pl.BlockSpec((B, t, d_model), lambda s: (0, s, 0)),
        compiler_params=cparams,
        cost_estimate=cost,
    )(table)
    return out


if __name__ == "__main__":
    key = jax.random.PRNGKey(0)
    k1, k2 = jax.random.split(key)

    # --- small shape matching the module (B=2, S=8, d_model=32): fallback path ---
    d_model, max_len = 32, 64
    B, S, F = 2, 8, 32
    x = jax.random.normal(k1, (B, S, F), dtype=jnp.float32)
    table = make_pos_emb_table(max_len, d_model)
    out = jax.block_until_ready(rel_position_embedding(x, table))
    ref = jnp.broadcast_to(table[:S, :][None, :, :], (B, S, d_model))
    assert out.shape == (B, S, d_model), out.shape
    assert out.dtype == jnp.float32, out.dtype
    assert jnp.allclose(out, ref, atol=1e-6, rtol=1e-6), "mismatch vs reference (small)"

    # --- slightly larger shape exercising the dense-copy (lane/sublane-aligned) path ---
    d2, L2 = 64, 128
    B2, S2 = 2, 64
    x2 = jax.random.normal(k2, (B2, S2, d2), dtype=jnp.float32)
    table2 = make_pos_emb_table(L2, d2)
    out2 = jax.block_until_ready(rel_position_embedding(x2, table2))
    ref2 = jnp.broadcast_to(table2[:S2, :][None, :, :], (B2, S2, d2))
    assert out2.shape == (B2, S2, d2), out2.shape
    assert out2.dtype == jnp.float32, out2.dtype
    assert jnp.allclose(out2, ref2, atol=1e-6, rtol=1e-6), "mismatch vs reference (aligned)"

    print("KERNEL_OK")
</pallas_src>

<mosaic_0001>
module attributes {stable_mosaic.version = 11 : i64} {
  func.func @_bcast_kernel(%arg0: i32, %arg1: memref<8x32xf32, #tpu.memory_space<vmem>>, %arg2: memref<2x8x32xf32, #tpu.memory_space<vmem>>) attributes {dimension_semantics = [#tpu.dimension_semantics<parallel>], iteration_bounds = array<i64: 1>, scalar_prefetch = 0 : i64, scratch_operands = 0 : i64, tpu.core_type = #tpu.core_type<tc>, window_params = [{transform_indices = @transform_0, window_bounds = array<i64: 8, 32>}, {transform_indices = @transform_1, window_bounds = array<i64: 2, 8, 32>}]} {
    %c0 = arith.constant 0 : index
    %c0_0 = arith.constant 0 : index
    %0 = vector.load %arg1[%c0, %c0_0] : memref<8x32xf32, #tpu.memory_space<vmem>>, vector<8x32xf32>
    %1 = vector.shape_cast %0 : vector<8x32xf32> to vector<1x8x32xf32>
    %2 = vector.shape_cast %1 : vector<1x8x32xf32> to vector<1x8x32xf32>
    %3 = vector.broadcast %2 : vector<1x8x32xf32> to vector<2x8x32xf32>
    %c0_1 = arith.constant 0 : index
    %c0_2 = arith.constant 0 : index
    %c0_3 = arith.constant 0 : index
    %4 = vector.load %arg2[%c0_1, %c0_2, %c0_3] : memref<2x8x32xf32, #tpu.memory_space<vmem>>, vector<2x8x32xf32>
    tpu.vector_store %arg2[%c0_1, %c0_2, %c0_3], %3 {strides = array<i32>} : memref<2x8x32xf32, #tpu.memory_space<vmem>>, vector<2x8x32xf32>,
    return
  }
  func.func @transform_0(%arg0: i32) -> (i32, i32) {
    %c0_i32 = arith.constant 0 : i32
    %c0_i32_0 = arith.constant 0 : i32
    return %arg0, %c0_i32 : i32, i32
  }
  func.func @transform_1(%arg0: i32) -> (i32, i32, i32) {
    %c0_i32 = arith.constant 0 : i32
    %c0_i32_0 = arith.constant 0 : i32
    %c0_i32_1 = arith.constant 0 : i32
    return %c0_i32, %arg0, %c0_i32_0 : i32, i32, i32
  }
}

</mosaic_0001>

<bundles_post_ra>
// kernel: tpu_custom_call.1
= control target key start
LH: loop header
LB: loop body
LE: loop exit
PB: predicated region body
PF: predicated region fallthrough
CT: control target
= control target key end

     0   :  { %6 = vsyncpa [#allocation3], 0  ;;  %s110_s0 = inlined_call_operand.hbm [shape: f32[8,32], index: 0, kind: input, shape index: {}]   ;;  %s111_s1 = inlined_call_operand.hbm [shape: f32[2,8,32], index: 1, kind: output, shape index: {}]  }
   0x1   :  { %7 = vsyncpa [#allocation4], 0  ;;  %s90_s6 = smov [#allocation2]  }
   0x2   :  { %s14_s7 = sshll.u32 %s90_s6, 4  ;;  %s15_s7 = int_to_ptr.vmem [resolvable:$true] %s14_s7 }
   0x3   :  { %s54_s8 = scalar_lea.vmem %s15_s7, 128  ;;  %p59_p1 = scmp.lt.s32.totalorder %s15_s7, %s15_s7 }
   0x4   :  { %p55_p0 = scmp.ne.s32.totalorder %s15_s7, %s54_s8  ;;  %p60_p2 = scmp.lt.s32.totalorder %s54_s8, %s54_s8 }
   0x6   :  { %p61_p3 = por %p60_p2, %p59_p1 }
   0x8   :  { %p62_p4 = pnand %p61_p3, %p55_p0 }
   0xa   :  { %65 = shalt.err (!%p62_p4)
}
   0xb   :  { %17 = dma.hbm_to_vmem [thread:$0]  %s110_s0, 128, %s15_s7, [#allocation3]  }
   0xc   :  { %86 = dma.done.wait [#allocation3], 128  }
   0xd   :  { %87 = vsyncadd [#allocation3], 4294967168  ;;  %s91_s11 = smov [#allocation5]   ;;  %vm22_vm0 = vcmask 261120   ;;  %v21_v0 = vld [vmem:[#allocation2] sm:$0xff] }
   0xe   :  { %s30_s12 = sshll.u32 %s91_s11, 4  ;;  %23 = vst.msk [vmem:[#allocation5] sm:$0xff] %vm22_vm0, %v21_v0  ;;  %24 = vst.msk [vmem:[#allocation5 + $0x8] sm:$0xff] %vm22_vm0, %v21_v0  ;;  %s31_s12 = int_to_ptr.vmem [resolvable:$true] %s30_s12 }
   0xf   :  { %s66_s13 = scalar_lea.vmem %s31_s12, 256  ;;  %p71_p6 = scmp.lt.s32.totalorder %s31_s12, %s31_s12 }
  0x10   :  { %p67_p5 = scmp.ne.s32.totalorder %s31_s12, %s66_s13  ;;  %p72_p7 = scmp.lt.s32.totalorder %s66_s13, %s66_s13 }
  0x12   :  { %p73_p8 = por %p72_p7, %p71_p6 }
  0x14   :  { %p74_p9 = pnand %p73_p8, %p67_p5 }
  0x16   :  { %77 = shalt.err (!%p74_p9)
}
  0x17   :  { %s92_s14 = smov 128   ;;  %s93_s15 = smov 8  }
  0x18   :  { %36 = dma.vmem_to_hbm [thread:$0]  %s31_s12, 256, %s111_s1, [#allocation4], %s92_s14, %s92_s14, %s93_s15  }
  0x19   :  { %88 = dma.done.wait [#allocation4], 256  }
  0x1a   :  { %89 = vsyncadd [#allocation4], 4294967040 }
  0x1b   :  { %40 = vsyncpa [#allocation3], 1 }
  0x1c   :  { %41 = vsyncpa [#allocation4], 1 }

</bundles_post_ra>
